<compile_context>
chip_gen: v6e
topology: v6e:2x2x1
jax: 0.10.0
libtpu: 0.0.40
codegen_flags: <defaults>
</compile_context>

<pallas_src>
from functools import partial

import jax
import jax.numpy as jnp
from jax.experimental import pallas as pl
from jax.experimental.pallas import tpu as pltpu


def _round_up(x, m):
    return (x + m - 1) // m * m


def al_encoder_kernel(xv_ref, xl_ref, tgt_col_ref, tgt_row_ref,
                      w_ref, w_al_ref, w_at_ref, out_ref):
    f32 = jnp.float32

    xl = xl_ref[0]             # [Ef, K]  f32: [lane feats | edge attrs | pad flag | 0-pad]
    xv = xv_ref[0]             # [Vf, v_dim] f32
    tgt_col = tgt_col_ref[0]   # [Ef, 1] int32 (per-graph vehicle offset baked in)
    tgt_row = tgt_row_ref[0]   # [1, Ef] int32

    Ef = xl.shape[0]
    Vf = xv.shape[0]

    # ---- h_lane = W(lane rows): wide MXU matmul, bf16 operands, f32 accumulate.
    # The folded eattr / pad-flag columns hit zero rows of W, so h_lane is exact.
    h_lane = jnp.dot(xl.astype(jnp.bfloat16), w_ref[...],
                     preferred_element_type=f32)                     # [Ef, D_pad]

    # ---- block-diagonal edge<->vehicle one-hots, built in both orientations ----
    veh_ids_g = jax.lax.broadcasted_iota(jnp.int32, (Ef, Vf), 1)
    gather_oh = (veh_ids_g == tgt_col).astype(f32)                   # [Ef, Vf]
    veh_ids_s = jax.lax.broadcasted_iota(jnp.int32, (Vf, Ef), 0)
    scatter_b = veh_ids_s == tgt_row                                  # [Vf, Ef]
    scatter_f32 = scatter_b.astype(f32)
    scatter_bf16 = scatter_b.astype(jnp.bfloat16)

    # ---- attention scores (f32 VPU mul + lane reduce; W folded into w_al / w_at).
    # s_lane already includes the eattr term and the -1e30 pad-edge bias.
    s_lane = jnp.sum(xl * w_al_ref[...], axis=-1, keepdims=True)      # [Ef, 1]
    s_veh = jnp.sum(xv * w_at_ref[...], axis=-1, keepdims=True)       # [Vf, 1]
    s_tgt = jnp.dot(gather_oh, s_veh, preferred_element_type=f32)     # [Ef, 1] gather

    score = s_lane + s_tgt
    score = jnp.where(score > 0, score, 0.01 * score)                 # leaky_relu(0.01)
    # TODO(synk): nn.Dropout on the scores is identity here (inference semantics).
    score = score - jnp.max(score)                                    # cancels per edge
    exp_s = jnp.exp(score)                                            # padded edges -> 0

    # ---- scatter-adds over edges (one-hot already in the MXU's native layout) ---
    denom = jnp.dot(scatter_f32, exp_s, preferred_element_type=f32)        # [Vf, 1]
    weighted = (h_lane * exp_s).astype(jnp.bfloat16)                       # [Ef, D_pad]
    agg = jnp.dot(scatter_bf16, weighted, preferred_element_type=f32)      # [Vf, D_pad]

    out = agg / (denom + 1e-16)                                            # exact divide
    out = jnp.where(out > 0, out, jnp.exp(jnp.minimum(out, 0.0)) - 1.0)    # ELU(alpha=1)
    out_ref[0] = out


@partial(jax.jit, static_argnames=("num_veh", "num_lane", "graphs_per_step"))
def _al_forward(lane_actor_enc, lane_actor_index, lane_actor_attr, W_t, a_w,
                *, num_veh, num_lane, graphs_per_step):
    """Fused preprocessing + pallas_call (single XLA fusion around the kernel)."""
    f32 = jnp.float32
    B, N, v_dim = lane_actor_enc.shape
    out_dim = W_t.shape[1]
    A = lane_actor_attr.shape[-1]
    E = num_lane
    assert N == num_veh + num_lane
    # TODO(synk): empty graphs (num_lane == 0) would need a guard before the softmax.
    assert E > 0, "empty graphs (num_lane == 0) are not supported"

    V_pad = _round_up(max(num_veh, 8), 8)
    E_pad = _round_up(max(E, 8), 8)
    D_pad = _round_up(out_dim, 128)
    K_raw = v_dim + A + 1                     # lane feats | edge attrs | pad flag
    K_in = _round_up(K_raw, 8)

    Bg = max(1, int(graphs_per_step))         # graphs fused per grid step
    steps = -(-B // Bg)
    B_pad = steps * Bg
    Ef = Bg * E_pad
    Vf = Bg * V_pad

    x = lane_actor_enc.astype(f32)

    # vehicle rows (score path only; h[:num_veh] never materialized)
    x_veh = jnp.pad(x[:, :num_veh], ((0, B_pad - B), (0, V_pad - num_veh), (0, 0)))
    xv = x_veh.reshape(steps, Vf, v_dim)                                   # f32

    # lane rows with folded edge attributes and a pad-flag column
    lane_blk = jnp.concatenate([x[:, num_veh:], lane_actor_attr.astype(f32)], axis=-1)
    lane_blk = jnp.pad(lane_blk, ((0, B_pad - B), (0, E_pad - E), (0, 0)))
    pad_flag = jnp.broadcast_to(
        (jnp.arange(E_pad) >= E).astype(f32)[None, :, None], (B_pad, E_pad, 1))
    xl = jnp.concatenate([lane_blk, pad_flag], axis=-1)
    xl = jnp.pad(xl, ((0, 0), (0, 0), (0, K_in - K_raw)))
    xl = xl.reshape(steps, Ef, K_in)                                       # f32

    # target indices with per-graph vehicle offsets (block-diagonal one-hots)
    tgt = jnp.pad(lane_actor_index[:, 1, :].astype(jnp.int32),
                  ((0, B_pad - B), (0, E_pad - E)))
    g_off = (jnp.arange(B_pad, dtype=jnp.int32) % Bg) * V_pad
    tgt = (tgt + g_off[:, None]).reshape(steps, Ef)
    tgt_col = tgt[:, :, None]                                              # [steps, Ef, 1]
    tgt_row = tgt[:, None, :]                                              # [steps, 1, Ef]

    # parameter folding (weight-only preprocessing)
    a_lane = a_w[:out_dim].astype(f32)
    a_tgt = a_w[out_dim:2 * out_dim].astype(f32)
    a_attr = a_w[2 * out_dim:].astype(f32)
    w_al = jnp.concatenate([
        (W_t.astype(f32) @ a_lane)[:, 0],          # lane-feature part (W folded)
        a_attr[:, 0],                              # folded edge-attr part
        jnp.full((1,), -1e30, f32),                # pad-edge mask bias
        jnp.zeros((K_in - K_raw,), f32),
    ])[None, :]                                    # [1, K_in]
    w_at = (W_t.astype(f32) @ a_tgt).T             # [1, v_dim]
    W_pad = jnp.pad(W_t.astype(f32),
                    ((0, K_in - v_dim), (0, D_pad - out_dim))).astype(jnp.bfloat16)

    out = pl.pallas_call(
        al_encoder_kernel,
        out_shape=jax.ShapeDtypeStruct((steps, Vf, D_pad), f32),
        grid_spec=pltpu.PrefetchScalarGridSpec(
            num_scalar_prefetch=0,
            grid=(steps,),
            in_specs=[
                pl.BlockSpec((1, Vf, v_dim), lambda s: (s, 0, 0)),
                pl.BlockSpec((1, Ef, K_in), lambda s: (s, 0, 0)),
                pl.BlockSpec((1, Ef, 1), lambda s: (s, 0, 0)),
                pl.BlockSpec((1, 1, Ef), lambda s: (s, 0, 0)),
                pl.BlockSpec((K_in, D_pad), lambda s: (0, 0)),
                pl.BlockSpec((1, K_in), lambda s: (0, 0)),
                pl.BlockSpec((1, v_dim), lambda s: (0, 0)),
            ],
            out_specs=pl.BlockSpec((1, Vf, D_pad), lambda s: (s, 0, 0)),
        ),
        compiler_params=pltpu.CompilerParams(dimension_semantics=("parallel",)),
    )(xv, xl, tgt_col, tgt_row, W_pad, w_al, w_at)

    out = out.reshape(B_pad, V_pad, D_pad)[:B, :num_veh, :out_dim]
    return out


def al_encoder_layer(lane_actor_enc, num_veh, num_lane,
                     lane_actor_index, lane_actor_attr, W_t, a_w,
                     graphs_per_step=None):
    """ALEncoderLayer forward.

    Accepts a single graph (2D inputs, like the PyTorch module) or a leading batch
    of graphs sharing (num_veh, num_lane).
    W_t: [v_dim, out_dim] (transposed nn.Linear weight); a_w: [2*out_dim+edge_attr_dim, 1].
    """
    single = lane_actor_enc.ndim == 2
    if single:
        lane_actor_enc = lane_actor_enc[None]
        lane_actor_index = lane_actor_index[None]
        lane_actor_attr = lane_actor_attr[None]

    B = lane_actor_enc.shape[0]
    if graphs_per_step is None:
        V_pad = _round_up(max(num_veh, 8), 8)
        E_pad = _round_up(max(num_lane, 8), 8)
        # Two balanced grid steps: both v7x TensorCores get work; on v5e/v6e it
        # still amortizes per-step overhead B/2x vs one graph per step.
        target_steps = 2 if B >= 2 else 1
        Bg = -(-B // target_steps)
        # cap the dense block-diagonal one-hot (Bg*E_pad x Bg*V_pad) footprint
        while Bg > 1 and (Bg * E_pad) * (Bg * V_pad) > (1 << 20):
            Bg -= 1
        graphs_per_step = Bg

    out = _al_forward(lane_actor_enc, lane_actor_index, lane_actor_attr, W_t, a_w,
                      num_veh=num_veh, num_lane=num_lane,
                      graphs_per_step=int(graphs_per_step))
    return out[0] if single else out


def al_encoder_reference(x, num_veh, edge_index, edge_attr, W_t, a_w):
    """Pure-JAX f32 reference mirroring the PyTorch forward (dropout = identity)."""
    h = x @ W_t
    tgt = edge_index[1]
    h_lane, h_veh = h[num_veh:], h[:num_veh]
    attn_in = jnp.concatenate([h_lane, h_veh[tgt], edge_attr], axis=1)
    s = attn_in @ a_w
    s = jnp.where(s > 0, s, 0.01 * s)[:, 0]
    s = s - s.max()
    e = jnp.exp(s)
    denom = jax.ops.segment_sum(e, tgt, num_segments=num_veh)[tgt]
    attn = e / (denom + 1e-16)
    out = jax.ops.segment_sum(h_lane * attn[:, None], tgt, num_segments=num_veh)
    return jnp.where(out > 0, out, jnp.exp(out) - 1.0)


if __name__ == "__main__":
    num_veh, num_lane = 8, 16            # num_lane == number of lane->actor edges E
    v_dim, out_dim, edge_attr_dim = 32, 32, 2
    N = num_veh + num_lane

    key = jax.random.PRNGKey(0)
    k_x, k_attr, k_idx, k_w, k_a = jax.random.split(key, 5)

    B = 4
    lane_actor_enc = jax.random.normal(k_x, (B, N, v_dim), dtype=jnp.float32)
    lane_actor_attr = jax.random.normal(k_attr, (B, num_lane, edge_attr_dim), dtype=jnp.float32)
    tgt = jax.random.randint(k_idx, (B, num_lane), 0, num_veh, dtype=jnp.int32)
    src = jnp.broadcast_to(jnp.arange(num_lane, dtype=jnp.int32), (B, num_lane))
    lane_actor_index = jnp.stack([src, tgt], axis=1)   # [B, 2, E]

    # deterministic params (nn.Linear weights, no bias), stored pre-transposed
    W_t = 0.1 * jax.random.normal(k_w, (v_dim, out_dim), dtype=jnp.float32)
    a_w = 0.1 * jax.random.normal(k_a, (2 * out_dim + edge_attr_dim, 1), dtype=jnp.float32)

    # batched forward: 4 graphs fused into 2 grid steps (2 graphs/step)
    out = al_encoder_layer(lane_actor_enc, num_veh, num_lane,
                           lane_actor_index, lane_actor_attr, W_t, a_w)
    out = jax.block_until_ready(out)
    assert out.shape == (B, num_veh, out_dim)

    # bf16 MXU operands => loosened tolerance (score/softmax path kept f32)
    for b in range(B):
        ref = al_encoder_reference(lane_actor_enc[b], num_veh, lane_actor_index[b],
                                   lane_actor_attr[b], W_t, a_w)
        assert jnp.allclose(out[b], ref, atol=2e-2, rtol=2e-2), f"mismatch vs reference, graph {b}"

    # non-divisible batch (exercises the batch-padding / partial last step path)
    out3 = al_encoder_layer(lane_actor_enc[:3], num_veh, num_lane,
                            lane_actor_index[:3], lane_actor_attr[:3], W_t, a_w)
    out3 = jax.block_until_ready(out3)
    for b in range(3):
        ref = al_encoder_reference(lane_actor_enc[b], num_veh, lane_actor_index[b],
                                   lane_actor_attr[b], W_t, a_w)
        assert jnp.allclose(out3[b], ref, atol=2e-2, rtol=2e-2), f"mismatch (B=3), graph {b}"

    # single-graph path (module-equivalent 2D-in / 2D-out signature)
    out0 = al_encoder_layer(lane_actor_enc[0], num_veh, num_lane,
                            lane_actor_index[0], lane_actor_attr[0], W_t, a_w)
    out0 = jax.block_until_ready(out0)
    ref0 = al_encoder_reference(lane_actor_enc[0], num_veh, lane_actor_index[0],
                                lane_actor_attr[0], W_t, a_w)
    assert out0.shape == (num_veh, out_dim)
    assert jnp.allclose(out0, ref0, atol=2e-2, rtol=2e-2), "mismatch vs reference (single graph)"

    print("KERNEL_OK")
</pallas_src>

<mosaic_0001>
module attributes {stable_mosaic.version = 11 : i64} {
  func.func @al_encoder_kernel(%arg0: i32, %arg1: memref<1x16x32xf32, #tpu.memory_space<vmem>>, %arg2: memref<1x32x40xf32, #tpu.memory_space<vmem>>, %arg3: memref<1x32x1xi32, #tpu.memory_space<vmem>>, %arg4: memref<1x1x32xi32, #tpu.memory_space<vmem>>, %arg5: memref<40x128xbf16, #tpu.memory_space<vmem>>, %arg6: memref<1x40xf32, #tpu.memory_space<vmem>>, %arg7: memref<1x32xf32, #tpu.memory_space<vmem>>, %arg8: memref<1x16x128xf32, #tpu.memory_space<vmem>>) attributes {dimension_semantics = [#tpu.dimension_semantics<parallel>], iteration_bounds = array<i64: 2>, scalar_prefetch = 0 : i64, scratch_operands = 0 : i64, tpu.core_type = #tpu.core_type<tc>, window_params = [{transform_indices = @transform_0, window_bounds = array<i64: 1, 16, 32>}, {transform_indices = @transform_1, window_bounds = array<i64: 1, 32, 40>}, {transform_indices = @transform_2, window_bounds = array<i64: 1, 32, 1>}, {transform_indices = @transform_3, window_bounds = array<i64: 1, 1, 32>}, {pipeline_mode = #tpu.pipeline_mode<synchronous>, transform_indices = @transform_4, window_bounds = array<i64: 40, 128>}, {pipeline_mode = #tpu.pipeline_mode<synchronous>, transform_indices = @transform_5, window_bounds = array<i64: 1, 40>}, {pipeline_mode = #tpu.pipeline_mode<synchronous>, transform_indices = @transform_6, window_bounds = array<i64: 1, 32>}, {transform_indices = @transform_7, window_bounds = array<i64: 1, 16, 128>}]} {
    %c0 = arith.constant 0 : index
    %c0_0 = arith.constant 0 : index
    %c0_1 = arith.constant 0 : index
    %0 = vector.load %arg2[%c0, %c0_0, %c0_1] : memref<1x32x40xf32, #tpu.memory_space<vmem>>, vector<1x32x40xf32>
    %1 = vector.shape_cast %0 : vector<1x32x40xf32> to vector<32x40xf32>
    %c0_2 = arith.constant 0 : index
    %c0_3 = arith.constant 0 : index
    %c0_4 = arith.constant 0 : index
    %2 = vector.load %arg1[%c0_2, %c0_3, %c0_4] : memref<1x16x32xf32, #tpu.memory_space<vmem>>, vector<1x16x32xf32>
    %3 = vector.shape_cast %2 : vector<1x16x32xf32> to vector<16x32xf32>
    %c0_5 = arith.constant 0 : index
    %c0_6 = arith.constant 0 : index
    %c0_7 = arith.constant 0 : index
    %4 = vector.load %arg3[%c0_5, %c0_6, %c0_7] : memref<1x32x1xi32, #tpu.memory_space<vmem>>, vector<1x32x1xi32>
    %5 = vector.shape_cast %4 : vector<1x32x1xi32> to vector<32x1xi32>
    %c0_8 = arith.constant 0 : index
    %c0_9 = arith.constant 0 : index
    %c0_10 = arith.constant 0 : index
    %6 = vector.load %arg4[%c0_8, %c0_9, %c0_10] : memref<1x1x32xi32, #tpu.memory_space<vmem>>, vector<1x1x32xi32>
    %7 = vector.shape_cast %6 : vector<1x1x32xi32> to vector<1x32xi32>
    %8 = arith.truncf %1 : vector<32x40xf32> to vector<32x40xbf16>
    %c0_11 = arith.constant 0 : index
    %c0_12 = arith.constant 0 : index
    %9 = vector.load %arg5[%c0_11, %c0_12] : memref<40x128xbf16, #tpu.memory_space<vmem>>, vector<40x128xbf16>
    %cst = arith.constant dense<0.000000e+00> : vector<32x128xf32>
    %10 = tpu.matmul %8, %9, %cst {dimension_numbers = #tpu.dot_dimension_numbers<[1], [0], [0], [1], [0, 0, 1, 1], [], []>} : vector<32x40xbf16>, vector<40x128xbf16>, vector<32x128xf32> -> vector<32x128xf32>
    %11 = tpu.iota {dimensions = array<i32: 1>} : vector<32x16xi32>
    %12 = vector.broadcast %5 : vector<32x1xi32> to vector<32x16xi32>
    %13 = arith.cmpi eq, %11, %12 : vector<32x16xi32>
    %14 = arith.extui %13 : vector<32x16xi1> to vector<32x16xi32>
    %15 = arith.sitofp %14 : vector<32x16xi32> to vector<32x16xf32>
    %16 = tpu.iota {dimensions = array<i32: 0>} : vector<16x32xi32>
    %17 = vector.broadcast %7 : vector<1x32xi32> to vector<16x32xi32>
    %18 = arith.cmpi eq, %16, %17 : vector<16x32xi32>
    %19 = arith.extui %18 : vector<16x32xi1> to vector<16x32xi32>
    %20 = arith.sitofp %19 : vector<16x32xi32> to vector<16x32xf32>
    %21 = arith.extui %18 : vector<16x32xi1> to vector<16x32xi32>
    %22 = arith.sitofp %21 : vector<16x32xi32> to vector<16x32xf32>
    %23 = arith.truncf %22 : vector<16x32xf32> to vector<16x32xbf16>
    %c0_13 = arith.constant 0 : index
    %c0_14 = arith.constant 0 : index
    %24 = vector.load %arg6[%c0_13, %c0_14] : memref<1x40xf32, #tpu.memory_space<vmem>>, vector<1x40xf32>
    %25 = vector.broadcast %24 : vector<1x40xf32> to vector<32x40xf32>
    %26 = arith.mulf %1, %25 : vector<32x40xf32>
    %cst_15 = arith.constant dense<0.000000e+00> : vector<32xf32>
    %27 = vector.multi_reduction <add>, %26, %cst_15 [1] : vector<32x40xf32> to vector<32xf32>
    %28 = vector.shape_cast %27 : vector<32xf32> to vector<32x1xf32>
    %c0_16 = arith.constant 0 : index
    %c0_17 = arith.constant 0 : index
    %29 = vector.load %arg7[%c0_16, %c0_17] : memref<1x32xf32, #tpu.memory_space<vmem>>, vector<1x32xf32>
    %30 = vector.broadcast %29 : vector<1x32xf32> to vector<16x32xf32>
    %31 = arith.mulf %3, %30 : vector<16x32xf32>
    %cst_18 = arith.constant dense<0.000000e+00> : vector<16xf32>
    %32 = vector.multi_reduction <add>, %31, %cst_18 [1] : vector<16x32xf32> to vector<16xf32>
    %33 = vector.shape_cast %32 : vector<16xf32> to vector<16x1xf32>
    %cst_19 = arith.constant dense<0.000000e+00> : vector<32x1xf32>
    %34 = tpu.matmul %15, %33, %cst_19 {dimension_numbers = #tpu.dot_dimension_numbers<[1], [0], [0], [1], [0, 0, 1, 1], [], []>} : vector<32x16xf32>, vector<16x1xf32>, vector<32x1xf32> -> vector<32x1xf32>
    %35 = arith.addf %28, %34 : vector<32x1xf32>
    %cst_20 = arith.constant 0.000000e+00 : f32
    %36 = vector.broadcast %cst_20 : f32 to vector<32x1xf32>
    %37 = arith.cmpf ogt, %35, %36 : vector<32x1xf32>
    %cst_21 = arith.constant 0.00999999977 : f32
    %38 = vector.broadcast %cst_21 : f32 to vector<32x1xf32>
    %39 = arith.mulf %38, %35 : vector<32x1xf32>
    %40 = arith.select %37, %35, %39 : vector<32x1xi1>, vector<32x1xf32>
    %41 = vector.shape_cast %40 : vector<32x1xf32> to vector<1x32x1xf32>
    %cst_22 = arith.constant dense<0xFF800000> : vector<1xf32>
    %42 = vector.multi_reduction <maximumf>, %41, %cst_22 [1, 2] : vector<1x32x1xf32> to vector<1xf32>
    %43 = vector.shape_cast %42 : vector<1xf32> to vector<1x1x1xf32>
    %44 = vector.extract %43[0, 0, 0] : f32 from vector<1x1x1xf32>
    %45 = vector.broadcast %44 : f32 to vector<32x1xf32>
    %46 = arith.subf %40, %45 : vector<32x1xf32>
    %47 = math.exp %46 : vector<32x1xf32>
    %cst_23 = arith.constant dense<0.000000e+00> : vector<16x1xf32>
    %48 = tpu.matmul %20, %47, %cst_23 {dimension_numbers = #tpu.dot_dimension_numbers<[1], [0], [0], [1], [0, 0, 1, 1], [], []>} : vector<16x32xf32>, vector<32x1xf32>, vector<16x1xf32> -> vector<16x1xf32>
    %49 = vector.broadcast %47 : vector<32x1xf32> to vector<32x128xf32>
    %50 = arith.mulf %10, %49 : vector<32x128xf32>
    %51 = arith.truncf %50 : vector<32x128xf32> to vector<32x128xbf16>
    %cst_24 = arith.constant dense<0.000000e+00> : vector<16x128xf32>
    %52 = tpu.matmul %23, %51, %cst_24 {dimension_numbers = #tpu.dot_dimension_numbers<[1], [0], [0], [1], [0, 0, 1, 1], [], []>} : vector<16x32xbf16>, vector<32x128xbf16>, vector<16x128xf32> -> vector<16x128xf32>
    %cst_25 = arith.constant 1.000000e-16 : f32
    %53 = vector.broadcast %cst_25 : f32 to vector<16x1xf32>
    %54 = arith.addf %48, %53 : vector<16x1xf32>
    %55 = vector.broadcast %54 : vector<16x1xf32> to vector<16x128xf32>
    %56 = arith.divf %52, %55 : vector<16x128xf32>
    %cst_26 = arith.constant 0.000000e+00 : f32
    %57 = vector.broadcast %cst_26 : f32 to vector<16x128xf32>
    %58 = arith.cmpf ogt, %56, %57 : vector<16x128xf32>
    %cst_27 = arith.constant 0.000000e+00 : f32
    %59 = vector.broadcast %cst_27 : f32 to vector<16x128xf32>
    %60 = arith.minimumf %56, %59 : vector<16x128xf32>
    %61 = math.exp %60 : vector<16x128xf32>
    %cst_28 = arith.constant 1.000000e+00 : f32
    %62 = vector.broadcast %cst_28 : f32 to vector<16x128xf32>
    %63 = arith.subf %61, %62 : vector<16x128xf32>
    %64 = arith.select %58, %56, %63 : vector<16x128xi1>, vector<16x128xf32>
    %c0_29 = arith.constant 0 : index
    %c0_30 = arith.constant 0 : index
    %c0_31 = arith.constant 0 : index
    %65 = vector.load %arg8[%c0_29, %c0_30, %c0_31] : memref<1x16x128xf32, #tpu.memory_space<vmem>>, vector<1x16x128xf32>
    %66 = vector.shape_cast %65 : vector<1x16x128xf32> to vector<16x128xf32>
    %67 = vector.shape_cast %64 : vector<16x128xf32> to vector<1x16x128xf32>
    tpu.vector_store %arg8[%c0_29, %c0_30, %c0_31], %67 {strides = array<i32>} : memref<1x16x128xf32, #tpu.memory_space<vmem>>, vector<1x16x128xf32>,
    return
  }
  func.func @transform_0(%arg0: i32) -> (i32, i32, i32) {
    %c0_i32 = arith.constant 0 : i32
    %c0_i32_0 = arith.constant 0 : i32
    %c0_i32_1 = arith.constant 0 : i32
    return %arg0, %c0_i32, %c0_i32_0 : i32, i32, i32
  }
  func.func @transform_1(%arg0: i32) -> (i32, i32, i32) {
    %c0_i32 = arith.constant 0 : i32
    %c0_i32_0 = arith.constant 0 : i32
    %c0_i32_1 = arith.constant 0 : i32
    return %arg0, %c0_i32, %c0_i32_0 : i32, i32, i32
  }
  func.func @transform_2(%arg0: i32) -> (i32, i32, i32) {
    %c0_i32 = arith.constant 0 : i32
    %c0_i32_0 = arith.constant 0 : i32
    %c0_i32_1 = arith.constant 0 : i32
    return %arg0, %c0_i32, %c0_i32_0 : i32, i32, i32
  }
  func.func @transform_3(%arg0: i32) -> (i32, i32, i32) {
    %c0_i32 = arith.constant 0 : i32
    %c0_i32_0 = arith.constant 0 : i32
    %c0_i32_1 = arith.constant 0 : i32
    return %arg0, %c0_i32, %c0_i32_0 : i32, i32, i32
  }
  func.func @transform_4(%arg0: i32) -> (i32, i32) {
    %c0_i32 = arith.constant 0 : i32
    %c0_i32_0 = arith.constant 0 : i32
    %c0_i32_1 = arith.constant 0 : i32
    return %c0_i32, %c0_i32_0 : i32, i32
  }
  func.func @transform_5(%arg0: i32) -> (i32, i32) {
    %c0_i32 = arith.constant 0 : i32
    %c0_i32_0 = arith.constant 0 : i32
    %c0_i32_1 = arith.constant 0 : i32
    return %c0_i32, %c0_i32_0 : i32, i32
  }
  func.func @transform_6(%arg0: i32) -> (i32, i32) {
    %c0_i32 = arith.constant 0 : i32
    %c0_i32_0 = arith.constant 0 : i32
    %c0_i32_1 = arith.constant 0 : i32
    return %c0_i32, %c0_i32_0 : i32, i32
  }
  func.func @transform_7(%arg0: i32) -> (i32, i32, i32) {
    %c0_i32 = arith.constant 0 : i32
    %c0_i32_0 = arith.constant 0 : i32
    %c0_i32_1 = arith.constant 0 : i32
    return %arg0, %c0_i32, %c0_i32_0 : i32, i32, i32
  }
}

</mosaic_0001>

<bundles_post_ra>
// kernel: _al_forward.1
= control target key start
LH: loop header
LB: loop body
LE: loop exit
PB: predicated region body
PF: predicated region fallthrough
CT: control target
= control target key end

     0   :  { %12 = vsyncpa [#allocation3], 0  ;;  %s1395_s0 = inlined_call_operand.vmem [shape: f32[2,16,32], index: 0, kind: input, shape index: {}]   ;;  %s1396_s1 = inlined_call_operand.vmem [shape: f32[2,32,40], index: 1, kind: input, shape index: {}]   ;;  %s1397_s2 = inlined_call_operand.vmem [shape: s32[2,32,1], index: 2, kind: input, shape index: {}]   ;;  %s1398_s3 = inlined_call_operand.vmem [shape: s32[2,1,32], index: 3, kind: input, shape index: {}]   ;;  %s1399_s4 = inlined_call_operand.vmem [shape: bf16[40,128], index: 4, kind: input, shape index: {}]   ;;  %s1400_s5 = inlined_call_operand.vmem [shape: f32[1,40], index: 5, kind: input, shape index: {}]   ;;  %s1401_s6 = inlined_call_operand.vmem [shape: f32[1,32], index: 6, kind: input, shape index: {}]   ;;  %s1402_s7 = inlined_call_operand.hbm [shape: f32[2,16,128], index: 7, kind: output, shape index: {}]  }
   0x1   :  { %14 = vsyncpa [#allocation3 + $0x1], 0  ;;  %s1214_s24 = smov 0   ;;  %s1216_s25 = smov 0  }
   0x2   :  { %s1218_s26 = smov 0   ;;  %s1220_s27 = smov 0  }
   0x3 LB: > { %s1235_s28 = sadd.s32 4294967295, %s1166_s27   ;;  %s936_s29 = sadd.s32 4294967294, %s1166_s27   ;;  %s1166_s27 = sphi %s1220_s27, %s1408_s27   ;;  %s1162_s26 = sphi %s1218_s26, %s1407_s26   ;;  %s1158_s25 = sphi %s1216_s25, %s1406_s25   ;;  %s1154_s24 = sphi %s1214_s24, %s1405_s24  }
   0x4   : > { %s1239_s30 = sadd.s32 1, %s1166_s27   ;;  %s194_s8 = sadd.s32 1, %s1162_s26 }
   0x5   : > { %s191_s9 = ssub.s32 %s1166_s27, %s1239_s30  ;;  %p204_p0 = scmp.ne.s32.totalorder %s1162_s26, %s1158_s25 }
   0x6   : > { %p192_p1 = scmp.eq.s32.totalorder %s191_s9, 0  ;;  %p205_p2 = scmp.eq.s32.totalorder %s1235_s28, 1 }
   0x7   : > { %p210_p3 = scmp.ne.s32.totalorder %s1158_s25, %s1154_s24  ;;  %p211_p4 = scmp.eq.s32.totalorder %s936_s29, 1 }
   0x8   : > { %s1250_s10 = scalar_select %p192_p1, %s1162_s26, %s194_s8  }
   0x9   : > { %p1252_p5 = por %p205_p2, %p204_p0  ;;  %p1256_p6 = por %p211_p4, %p210_p3 }
   0xa   : > { %p939_p7 = scmp.ge.s32.totalorder %s1166_s27, 1  ;;  %p268_p8 = scmp.lt.s32.totalorder %s1166_s27, 3 }
   0xc   : > { %p269_p9 = pnand %p939_p7, %p268_p8 }
   0xd   : > { %p313_p10 = scmp.lt.s32.totalorder (!%p269_p9), %s1235_s28, 1  ;;  %s978_s16 = sshll.u32 (!%p269_p9), %s1235_s28, 8 }
   0xe   : > { %272 = sbr.rel (%p269_p9) target bundleno = 990 (0x3de), region = 48  ;;  %s1353_s19 = scalar_lea.hbm (!%p269_p9), %s1402_s7, %s978_s16 }
   0xf   : > { %s1171_s21 = smov (!%p269_p9), [#allocation2]  }
  0x10   : > { %s1110_s22 = sshll.u32 (!%p269_p9), %s1171_s21, 4  ;;  %s1111_s22 = int_to_ptr.vmem [resolvable:$false] %s1110_s22 }
  0x13   : > { %v1168_v0 = vmov 0   ;;  %s1264_s13 = scalar_select %p313_p10, %s1235_s28, 1  ;;  %v960_v1 = vld [vmem:[%s1401_s6] ss:$0 sm:$0xff]  ;;  %vm497_vm0 = vcmask 261120   ;;  %vm365_vm1 = vcmask 326656   ;;  %v425_v26 = vlaneseq }
  0x14   : > { %1085 = vset.pattern.permute.xlu1 %v1168_v0  ;;  %1086 = vset.pattern.permute.xlu0 %v1168_v0  ;;  %v959_v16 = vld [vmem:[%s1400_s5] ss:$0 sm:$0xff]  ;;  %vm504_vm2 = vcmask 130048   ;;  %v1169_v29 = vmov 0.0   ;;  %v1087_v39 = vld [vmem:[%s1399_s4 + $0x10] ss:$0 sps:$4 sm:$0xff]  }
  0x15   : > { %s975_s14 = sshll.u32 %s1264_s13, 4  ;;  %s976_s17 = sshll.u32 %s1264_s13, 5  ;;  %v426_v27 = vand.u32 127, %v425_v26  ;;  %vm372_vm7 = vcmask 1043456   ;;  %v1088_v40 = vld [vmem:[%s1399_s4 + $0x8] sm:$0xff]   ;;  %vm618_vm11 = vcmask 7168  }
  0x16   : > { %s317_s20 = scalar_lea.vmem %s1395_s0, %s975_s14  ;;  %s327_s23 = scalar_lea.vmem %s1397_s2, %s976_s17  ;;  %1038 = vmatprep.subr.msk.bf16.mxu0 %vm372_vm7, %v1087_v39  ;;  %v374_v41 = vsel %vm372_vm7, %v1087_v39, 0  ;;  %vm1170_vm15 = vmmov 0  }
  0x17   : > { %v337_v2 = vld [vmem:[%s317_s20 + $0x8] sm:$0xff]  ;;  %v336_v3 = vld [vmem:[%s317_s20] sm:$0xff]  ;;  %v341_v10 = vld [vmem:[%s327_s23 + $0x18] sm:$0xff]  ;;  %s322_s9 = scalar_lea.vmem %s1396_s1, %s976_s17  ;;  %1000 = vmatpush3.bf16.msra.mxu0 %v374_v41  ;;  %s330_s29 = scalar_lea.vmem %s1398_s3, %s1264_s13 }
  0x18   : > { %v338_v4 = vld [vmem:[%s327_s23] sm:$0xff]  ;;  %v496_v5 = vmul.f32 %v960_v1, %v337_v2  ;;  %v495_v6 = vmul.f32 %v960_v1, %v336_v3  ;;  %v339_v7 = vld [vmem:[%s327_s23 + $0x8] sm:$0xff]  ;;  %v340_v11 = vld [vmem:[%s327_s23 + $0x10] sm:$0xff]  ;;  %1001 = vmatprep.subr.bf16.mxu0 %v1088_v40  ;;  %s310_s13 = sand.u32 1, %s1158_s25   ;;  %s1112_s23 = scalar_lea.vmem %s1111_s22, 512 }
  0x19   : > { %428 = vperm.xlu1 %1085, %v338_v4   ;;  %v1282_v12 = vld [vmem:[%s322_s9 + $0x18] sm:$0xff]  ;;  %v1284_v13 = vld [vmem:[%s322_s9 + $0x10] sm:$0xff]  ;;  %v1288_v15 = vld [vmem:[%s322_s9] sm:$0xff]  ;;  %s1355_s20 = scalar_lea.sflag [#allocation3], %s310_s13 }
  0x1a   : > { %v501_v8 = vsel %vm497_vm0, %v496_v5, 0.0  ;;  %v498_v9 = vsel %vm497_vm0, %v495_v6, 0.0  ;;  %v344_v14 = vpack.c.bf16 %v1282_v12, %v1284_v13  ;;  %v472_v17 = vmul.f32 %v959_v16, %v1288_v15  ;;  %v1294_v18 = vld [vmem:[%s322_s9 + $0x8] sm:$0xff]  ;;  %v1089_v5 = vld [vmem:[%s1399_s4] sm:$0xff]   ;;  %s940_s9 = sshll.u32 %s310_s13, 4 }
  0x1b   : > { %502 = vadd.xlane.f32.xlu0 %v501_v8  ;;  %v473_v20 = vmul.f32 %v959_v16, %v1294_v18  ;;  %v475_v22 = vmul.f32 %v959_v16, %v1282_v12  ;;  %v474_v24 = vmul.f32 %v959_v16, %v1284_v13  ;;  %1002 = vmatpush3.bf16.msra.mxu0 %v1088_v40  ;;  %v956_v8 = vld [vmem:[%s330_s29] ss:$0 sm:$0xff]  ;;  %s312_s14 = scalar_lea.vmem [#allocation2], %s940_s9 }
  0x1c   : > { %v476_v19 = vsel %vm365_vm1, %v472_v17, 0.0  ;;  %1003 = vmatprep.subr.bf16.mxu0 %v1089_v5  ;;  %v343_v6 = vpack.c.bf16 %v1294_v18, %v1288_v15  ;;  %s841_s15 = sshll.u32 %s312_s14, 4  ;;  %s1348_s15 = int_to_ptr.vmem [resolvable:$true] %s841_s15 }
  0x1d   : > { %431 = vperm.xlu1 %1085, %v339_v7   ;;  %v479_v21 = vsel %vm365_vm1, %v473_v20, 0.0  ;;  %v485_v23 = vsel %vm365_vm1, %v475_v22, 0.0  ;;  %v482_v25 = vsel %vm365_vm1, %v474_v24, 0.0  ;;  %v452_v7 = vshrl.u32 %v425_v26, 7  ;;  %s1106_s28 = scalar_lea.vmem %s1348_s15, 256  ;;  %p1113_p0 = scmp.lt.s32.totalorder %s1348_s15, %s1111_s22 }
  0x1e   : > { %1005 = vmatprep.mubr.msk.bf16.mxu0 %vm365_vm1, %v343_v6  ;;  %p1107_p11 = scmp.ne.s32.totalorder %s1348_s15, %s1106_s28  ;;  %p1114_p1 = scmp.lt.s32.totalorder %s1112_s23, %s1106_s28 }
  0x1f   : > { %499 = vadd.xlane.f32.xlu0 %v498_v9  ;;  %1004 = vmatpush3.bf16.msra.mxu0 %v1089_v5  ;;  %v453_v9 = vadd.s32 8, %v452_v7  ;;  %vm458_vm13 = vcmp.eq.s32.totalorder %v452_v7, %v956_v8 }
  0x20   : > { %p1108_p12 = pnand %p1107_p11, %p1252_p5  ;;  %p1115_p2 = por %p1114_p1, %p1113_p0 }
  0x21   : > { %437 = vperm.xlu1 %1085, %v341_v10   ;;  %vm459_vm14 = vcmp.eq.s32.totalorder %v453_v9, %v956_v8  ;;  %v1335_v10 = vsel %vm458_vm13, 1.0, %v1169_v29 }
  0x22   : > { %1006 = vmatmul.mubr.msk.bf16.vlgmr.msra.gmra.mxu0 %vm365_vm1, %v344_v14  ;;  %p1109_p13 = pneg %p1108_p12 }
  0x23   : > { %1035 = vmatprep.mubr.msk.f32.mxu0 %vm497_vm0, %v1335_v10 }
  0x24   : > { %p1116_p3 = pnand %p1115_p2, %p1109_p13 }
  0x35   : > { %434 = vperm.xlu0 %1086, %v340_v11  }
  0x45   : > { %477 = vadd.xlane.f32.xlu1 %v476_v19 }
  0x49   : > { %480 = vadd.xlane.f32.xlu1 %v479_v21 }
  0x4d   : > { %486 = vadd.xlane.f32.xlu1 %v485_v23 }
  0x54   : > { %483 = vadd.xlane.f32.xlu0 %v482_v25 }
  0x94   : > { %v429_v28 = vpop.permute.xlu1 %428 }
  0x95   : > { %vm439_vm3 = vcmp.eq.s32.totalorder %v426_v27, %v429_v28 }
  0x96   : > { %v952_v30 = vsel %vm439_vm3, 1.0, %v1169_v29 }
  0x97   : > { %1013 = vmatprep.mubr.msk.f32.mxu1 %vm504_vm2, %v952_v30 }
  0x98   : > { %v432_v32 = vpop.permute.xlu1 %431 }
  0x99   : > { %vm440_vm4 = vcmp.eq.s32.totalorder %v426_v27, %v432_v32  ;;  %v958_v32 = vsel %vm459_vm14, 1.0, %v1169_v29 }
  0x9a   : > { %v953_v33 = vsel %vm440_vm4, 1.0, %v1169_v29 }
  0x9c   : > { %v438_v35 = vpop.permute.xlu1 %437 }
  0x9d   : > { %vm442_vm5 = vcmp.eq.s32.totalorder %v426_v27, %v438_v35 }
  0x9e   : > { %v955_v38 = vsel %vm442_vm5, 1.0, %v1169_v29 }
  0xa4   : > { %v503_v31 = vpop.xlane.xlu0 %502 }
  0xa5   : > { %1009 = vmatprep.subr.mxu1 %v503_v31 }
  0xa6   : > { %1010 = vmatpush3.msra.mxu1 %v503_v31 }
  0xa8   : > { %v500_v34 = vpop.xlane.xlu0 %499 }
  0xa9   : > { %1011 = vmatprep.subr.mxu1 %v500_v34 }
  0xaa   : > { %1012 = vmatpush3.msra.mxu1 %v500_v34 }
  0xab   : > { %1014 = vmatmul.mubr.msk.f32.vlgmr.msra.gmra.mxu1 %vm504_vm2, %v953_v33  ;;  %1019 = vmatprep.subr.bf16.mxu1 %v1169_v29 }
  0xb0   : > { %v435_v36 = vpop.permute.xlu0 %434 }
  0xb1   : > { %vm441_vm6 = vcmp.eq.s32.totalorder %v426_v27, %v435_v36 }
  0xb2   : > { %v954_v37 = vsel %vm441_vm6, 1.0, %v1169_v29 }
  0xb3   : > { %1016 = vmatprep.mubr.msk.f32.mxu1 %vm504_vm2, %v954_v37 }
  0xb4   : > { %1017 = vmatmul.mubr.msk.f32.gmra.mxu1 %vm504_vm2, %v955_v38 }
  0xb5   : > { %1023 = vmatprep.mubr.msk.bf16.mxu1 %vm1170_vm15, %v1169_v29 }
  0xce   : > { %v478_v42 = vpop.xlane.xlu1 %477 }
  0xd2   : > { %v481_v45 = vpop.xlane.xlu1 %480 }
  0xd6   : > { %v487_v48 = vpop.xlane.xlu1 %486 }
  0xdd   : > { %v484_v51 = vpop.xlane.xlu0 %483 }
  0xe2   : > { %v1007_v33 = vpop.f32.mrf.mxu0 }
  0xe4   : > { %v410_v34 = vpop.f32.mrf.mxu0 }
  0xe6   : > { %v1008_v36 = vpop.f32.mrf.mxu0 }
  0xe8   : > { %v413_v40 = vpop.f32.mrf.mxu0 }
 0x16b   : > { %v1015_v43 = vpop.f32.mrf.mxu1 }
 0x16c   : > { %v603_v47 = vadd.f32 %v1015_v43, %v481_v45 }
 0x16d   : > { %v583_v44 = vpop.f32.mrf.mxu1 }
 0x16e   : > { %v602_v46 = vadd.f32 %v583_v44, %v478_v42  ;;  %v611_v52 = vmul.f32 0.01, %v603_v47  ;;  %vm607_vm9 = vcmp.gt.f32.partialorder %v603_v47, 0.0 }
 0x170   : > { %v610_v49 = vmul.f32 0.01, %v602_v46  ;;  %vm606_vm8 = vcmp.gt.f32.partialorder %v602_v46, 0.0  ;;  %v615_v58 = vsel %vm607_vm9, %v603_v47, %v611_v52  ;;  %v464_v47 = vpack.c.bf16 %v958_v32, %v1335_v10 }
 0x171   : > { %v620_v63 = vsel %vm618_vm11, %v615_v58, -inf }
 0x172   : > { %v614_v55 = vsel %vm606_vm8, %v602_v46, %v610_v49 }
 0x173   : > { %v619_v61 = vsel %vm618_vm11, %v614_v55, -inf }
 0x174   : > { %v1018_v50 = vpop.f32.mrf.mxu1  ;;  %v623_v2 = vmax.f32 %v619_v61, %v620_v63 }
 0x175   : > { %v605_v53 = vadd.f32 %v1018_v50, %v487_v48 }
 0x176   : > { %v593_v54 = vpop.f32.mrf.mxu1 }
 0x177   : > { %vm609_vm10 = vcmp.gt.f32.partialorder %v605_v53, 0.0  ;;  %v613_v56 = vmul.f32 0.01, %v605_v53  ;;  %v604_v57 = vadd.f32 %v593_v54, %v484_v51 }
 0x179   : > { %v617_v59 = vsel %vm609_vm10, %v605_v53, %v613_v56  ;;  %vm608_vm12 = vcmp.gt.f32.partialorder %v604_v57, 0.0  ;;  %v612_v60 = vmul.f32 0.01, %v604_v57 }
 0x17a   : > { %v622_v1 = vsel %vm618_vm11, %v617_v59, -inf }
 0x17b   : > { %v616_v62 = vsel %vm608_vm12, %v604_v57, %v612_v60 }
 0x17c   : > { %v621_v0 = vsel %vm618_vm11, %v616_v62, -inf }
 0x17d   : > { %v624_v3 = vmax.f32 %v621_v0, %v622_v1 }
 0x17f   : > { %v625_v4 = vmax.f32 %v623_v2, %v624_v3 }
 0x181   : > { %626 = vmax.xlane.f32.xlu1 %v625_v4 }
 0x20a   : > { %v627_v11 = vpop.xlane.xlu1 %626 }
 0x20b   : > { %v628_v12 = vrot.slane %v627_v11, 4 }
 0x20d   : > { %v629_v13 = vmax.f32 %v627_v11, %v628_v12 }
 0x20f   : > { %v630_v14 = vrot.slane %v629_v13, 2 }
 0x211   : > { %v631_v15 = vmax.f32 %v629_v13, %v630_v14 }
 0x213   : > { %v632_v16 = vrot.slane %v631_v15, 1 }
 0x215   : > { %v633_v17 = vmax.f32 %v631_v15, %v632_v16 }
 0x217   : > { %1039 = vpush %v633_v17 }
 0x248   : > { %s1040_s8 = spop %1039 }
 0x249   : > { %v635_v18 = vstv %s1040_s8 }
 0x24a   : > { %v637_v19 = vsub.f32 %v615_v58, %v635_v18  ;;  %v638_v20 = vsub.f32 %v616_v62, %v635_v18  ;;  %v639_v21 = vsub.f32 %v617_v59, %v635_v18  ;;  %v636_v25 = vsub.f32 %v614_v55, %v635_v18 }
 0x24c   : > { %v642_v22 = vmul.f32 1.442695, %v637_v19  ;;  %v644_v23 = vmul.f32 1.442695, %v638_v20  ;;  %v646_v24 = vmul.f32 1.442695, %v639_v21 }
 0x24d   : > { %v640_v26 = vmul.f32 1.442695, %v636_v25 }
 0x24e   : > { %1090 = vpow2.f32 %v642_v22 }
 0x24f   : > { %1092 = vpow2.f32 %v644_v23 }
 0x250   : > { %1094 = vpow2.f32 %v646_v24 }
 0x251   : > { %1096 = vpow2.f32 %v640_v26 }
 0x25b   : > { %v1091_v27 = vpop.eup %1090 }
 0x25c   : > { %v1093_v28 = vpop.eup %1092  ;;  %655 = vperm.xlu0 %1086, %v1091_v27  }
 0x25d   : > { %v1095_v30 = vpop.eup %1094  ;;  %660 = vperm.xlu1 %1085, %v1093_v28  }
 0x25e   : > { %1027 = vmatprep.subr.mxu0 %v1095_v30  ;;  %v1097_v31 = vpop.eup %1096 }
 0x25f   : > { %1028 = vmatpush3.msra.mxu0 %v1095_v30 }
 0x260   : > { %1029 = vmatprep.subr.mxu0 %v1093_v28 }
 0x261   : > { %1030 = vmatpush3.msra.mxu0 %v1093_v28  ;;  %665 = vperm.xlu1 %1085, %v1095_v30  }
 0x262   : > { %1031 = vmatprep.subr.mxu0 %v1091_v27 }
 0x263   : > { %1032 = vmatpush3.msra.mxu0 %v1091_v27 }
 0x264   : > { %1033 = vmatprep.subr.mxu0 %v1097_v31 }
 0x265   : > { %1034 = vmatpush3.msra.mxu0 %v1097_v31  ;;  %650 = vperm.xlu1 %1085, %v1097_v31  }
 0x266   : > { %1036 = vmatmul.mubr.msk.f32.vlgmr.msra.gmra.mxu0 %vm497_vm0, %v958_v32 }
 0x2d7   : > { %v656_v41 = vpop.permute.xlu0 %655 }
 0x2d8   : > { %v661_v35 = vpop.permute.xlu1 %660  ;;  %v669_v44 = vmul.f32 %v656_v41, %v413_v40 }
 0x2d9   : > { %v670_v38 = vmul.f32 %v1007_v33, %v661_v35 }
 0x2dc   : > { %v666_v37 = vpop.permute.xlu1 %665 }
 0x2dd   : > { %v671_v39 = vmul.f32 %v1008_v36, %v666_v37 }
 0x2df   : > { %v673_v42 = vpack.c.bf16 %v671_v39, %v670_v38 }
 0x2e0   : > { %v651_v43 = vpop.permute.xlu1 %650 }
 0x2e1   : > { %v668_v45 = vmul.f32 %v651_v43, %v410_v34  ;;  %1020 = vmatpush3.bf16.msra.mxu1 %v673_v42 }
 0x2e2   : > { %1021 = vmatprep.subr.bf16.mxu1 %v1169_v29 }
 0x2e3   : > { %v672_v46 = vpack.c.bf16 %v669_v44, %v668_v45 }
 0x2e5   : > { %1022 = vmatpush3.bf16.msra.mxu1 %v672_v46 }
 0x2e8   : > { %1024 = vmatmul.mubr.msk.bf16.vlgmr.msra.gmra.mxu1 %vm497_vm0, %v464_v47 }
 0x326   : > { %v1037_v48 = vpop.f32.mrf.mxu0 }
 0x327   : > { %v796_v51 = vadd.f32 1e-16, %v1037_v48 }
 0x328   : > { %v790_v49 = vpop.f32.mrf.mxu0 }
 0x329   : > { %v791_v50 = vadd.f32 1e-16, %v790_v49 }
 0x32b   : > { %801 = vperm.xlu1 %1085, %v791_v50  }
 0x32f   : > { %806 = vperm.xlu1 %1085, %v796_v51  }
 0x3a6   : > { %v802_v52 = vpop.permute.xlu1 %801 }
 0x3a7   : > { %1098 = vrcp.f32 %v802_v52 }
 0x3a8   : > { %v711_v53 = vpop.f32.mrf.mxu1 }
 0x3aa   : > { %v807_v54 = vpop.permute.xlu1 %806  ;;  %v1025_v55 = vpop.f32.mrf.mxu1 }
 0x3ab   : > { %1100 = vrcp.f32 %v807_v54 }
 0x3ac   : > { %v714_v29 = vpop.f32.mrf.mxu1 }
 0x3ae   : > { %v1026_v56 = vpop.f32.mrf.mxu1 }
 0x3b4   : > { %v1099_v57 = vpop.eup %1098 }
 0x3b5   : > { %v810_v58 = vmul.f32 %v1099_v57, %v711_v53 }
 0x3b7   : > { %v815_v59 = vmin.f32 %v810_v58, 0.0  ;;  %vm813_vm0 = vcmp.gt.f32.partialorder %v810_v58, 0.0 }
 0x3b8   : > { %v1101_v60 = vpop.eup %1100 }
 0x3b9   : > { %v817_v61 = vmul.f32 1.442695, %v815_v59  ;;  %v812_v62 = vmul.f32 %v1101_v60, %v714_v29 }
 0x3bb   : > { %1102 = vpow2.f32 %v817_v61  ;;  %v816_v63 = vmin.f32 %v812_v62, 0.0  ;;  %vm814_vm1 = vcmp.gt.f32.partialorder %v812_v62, 0.0 }
 0x3bd   : > { %v819_v0 = vmul.f32 1.442695, %v816_v63 }
 0x3bf   : > { %1104 = vpow2.f32 %v819_v0 }
 0x3c8   : > { %v1103_v1 = vpop.eup %1102 }
 0x3c9   : > { %v968_v2 = vadd.f32 -1.0, %v1103_v1 }
 0x3cb   : > { %v823_v3 = vsel %vm813_vm0, %v810_v58, %v968_v2 }
 0x3cc   : > { %v1105_v4 = vpop.eup %1104  ;;  %825 = vst [vmem:[%s312_s14] sm:$0xff] %v823_v3 }
 0x3cd   : > { %v969_v5 = vadd.f32 -1.0, %v1105_v4 }
 0x3cf   : > { %v824_v6 = vsel %vm814_vm1, %v812_v62, %v969_v5 }
 0x3d0   : > { %826 = vst [vmem:[%s312_s14 + $0x8] sm:$0xff] %v824_v6 }
 0x3d1   : > { %1119 = shalt.err (!%p1116_p3)
}
 0x3d2   : > { %s1120_s29 = scalar_lea.hbm %s1353_s19, 256  ;;  %s1124_s9 = scalar_lea.hbm %s1402_s7, 512 }
 0x3d3   : > { %p1121_p4 = scmp.ne.s32.totalorder %s1353_s19, %s1120_s29  ;;  %p1125_p9 = scmp.lt.s32.totalorder %s1353_s19, %s1402_s7 }
 0x3d4   : > { %p1126_p10 = scmp.lt.s32.totalorder %s1124_s9, %s1120_s29 }
 0x3d5   : > { %p1122_p7 = pnand %p1121_p4, %p1252_p5 }
 0x3d6   : > { %p1127_p11 = por %p1126_p10, %p1125_p9 }
 0x3d7   : > { %p1123_p8 = pneg %p1122_p7 }
 0x3d9   : > { %p1128_p12 = pnand %p1127_p11, %p1123_p8 }
 0x3db   : > { %1131 = shalt.err (!%p1128_p12)
}
 0x3dc   : > { %s1172_s17 = smov 128   ;;  %s1173_s18 = smov 8  }
 0x3dd   : > { %1041 = dma.vmem_to_hbm [thread:$0]  (%p1252_p5), %s1348_s15, 256, %s1353_s19, %s1355_s20, %s1172_s17, %s1172_s17, %s1173_s18  }
 0x3de PF: > { %p1047_p13 = scmp.ge.s32.totalorder %s1166_s27, 2  ;;  %s856_s28 = sand.u32 1, %s1154_s24  }
 0x3df   : > { %s857_s21 = scalar_lea.sflag [#allocation3], %s856_s28 }
 0x3e0   : > { %p1044_p0 = pnand %p1047_p13, %p1256_p6 }
 0x3e2   : > { %p1045_p1 = pneg %p1044_p0 }
 0x3e4   : > { %1149 = dma.done.wait (%p1045_p1), %s857_s21, 256  }
 0x3e5   : > { %1151 = vsyncadd (%p1045_p1), %s857_s21, 4294967040  ;;  %p17_p2 = scmp.ge.s32.totalorder %s1239_s30, 4   ;;  %s1405_s24 = smov %s1158_s25 }
 0x3e6   : > { %s1406_s25 = smov %s1162_s26  ;;  %s1407_s26 = smov %s1250_s10 }
 0x3e7   : > { %s1408_s27 = smov %s1239_s30  ;;  %19 = sbr.rel (!%p17_p2) target bundleno = 3 (0x3), region = 92 }
 0x3ec   :  { %862 = vsyncpa [#allocation3], 1 }
 0x3ed   :  { %864 = vsyncpa [#allocation3 + $0x1], 1 }

</bundles_post_ra>
